<compile_context>
chip_gen: v5e
topology: v5e:2x2
jax: 0.10.0
libtpu: 0.0.40
codegen_flags: <defaults>
</compile_context>

<pallas_src>
import functools

import jax
import jax.numpy as jnp
from jax.experimental import pallas as pl
from jax.experimental.pallas import tpu as pltpu

_LANES = 128
_SUBLANES = 8


def _entropy_sum_kernel(x_ref, o_ref, *, eps, rows, tile_r, n_inner,
                        total_blocks, ragged):
    s = pl.program_id(0)       # split axis (one per TensorCore), "parallel"
    j = pl.program_id(1)       # tile axis (reduction), "arbitrary"

    @pl.when(j == 0)
    def _():
        o_ref[...] = jnp.zeros_like(o_ref)

    x = x_ref[...].astype(jnp.float32)            # [tile_r, 128] in VMEM
    v = x * jnp.log(x + eps)                      # VPU mul + EUP log

    def fold(a):                                  # [tile_r,128] -> [8,128]
        # Pure vreg adds (leading-axis reduction); no XLU per step.
        return a.reshape(tile_r // _SUBLANES, _SUBLANES, _LANES).sum(axis=0)

    if ragged:
        blk = s * n_inner + j
        is_tail = blk == (total_blocks - 1)

        @pl.when(jnp.logical_not(is_tail))
        def _():
            o_ref[...] += fold(v)

        @pl.when(is_tail)
        def _():
            # Only the single ragged tail block pays for the row mask.
            row = jax.lax.broadcasted_iota(jnp.int32, v.shape, 0)
            valid = (blk * tile_r + row) < rows
            o_ref[...] += fold(jnp.where(valid, v, 0.0))
    else:
        o_ref[...] += fold(v)


def _chip_plan():
    """Returns (#TensorCores to split across, per-buffer tile byte budget)."""
    kind = ""
    try:
        kind = jax.devices()[0].device_kind.lower()
    except Exception:
        pass
    if "v7" in kind:
        return 2, 4 * 1024 * 1024          # 2 TCs, 64 MiB VMEM -> smaller tiles
    if "v4" in kind or "v5p" in kind:
        return 2, 8 * 1024 * 1024          # other megacore chips
    return 1, 8 * 1024 * 1024              # v5e / v6e: single TensorCore


def _plan_tiles(rows, itemsize, want_splits, tile_budget_bytes):
    """Plan (num_splits, n_inner, tile_r, total_blocks) such that
    (total_blocks - 1) * tile_r < rows (no fully out-of-range block)."""
    lane_bytes = _LANES * itemsize
    tile_r_max = max(_SUBLANES,
                     (tile_budget_bytes // lane_bytes) // _SUBLANES * _SUBLANES)
    base_blocks = pl.cdiv(rows, tile_r_max)
    splits = max(1, want_splits)
    while True:
        total_blocks = splits * pl.cdiv(base_blocks, splits)
        tile_r = max(_SUBLANES,
                     pl.cdiv(pl.cdiv(rows, total_blocks), _SUBLANES) * _SUBLANES)
        if splits == 1 or (total_blocks - 1) * tile_r < rows:
            return splits, total_blocks // splits, tile_r, total_blocks
        splits = 1   # fall back: the single-split plan is always valid


def entropy_loss(x, eps=1e-07, *, _tile_budget_bytes=None):
    """Pallas TPU implementation of EntropyLoss.forward.

    x: [..., C] probabilities (f32 or bf16).  The mean is over all leading
    dims, matching torch.mean(-sum(x * log(x + eps), dim=-1)).
    """
    num_rows = x.size // x.shape[-1]          # number of terms in the mean
    itemsize = jnp.dtype(x.dtype).itemsize

    flat = x.reshape(-1)
    rem = x.size % _LANES
    if rem:
        # Zero padding is exact: 0 * log(0 + eps) == 0.  (Free reshape when
        # the element count is already a multiple of 128, e.g. C == 128.)
        flat = jnp.pad(flat, (0, _LANES - rem))
    slab = flat.reshape(-1, _LANES)           # lane-dense (R, 128) slab
    R = slab.shape[0]

    want_splits, budget = _chip_plan()
    if _tile_budget_bytes is not None:
        budget = _tile_budget_bytes
    num_splits, n_inner, tile_r, total_blocks = _plan_tiles(
        R, itemsize, want_splits, budget)
    ragged = (total_blocks * tile_r) != R

    kernel = functools.partial(
        _entropy_sum_kernel, eps=eps, rows=R, tile_r=tile_r,
        n_inner=n_inner, total_blocks=total_blocks, ragged=ragged)

    tile_bytes = tile_r * _LANES * itemsize
    partials = pl.pallas_call(
        kernel,
        out_shape=jax.ShapeDtypeStruct((num_splits, _SUBLANES, _LANES),
                                       jnp.float32),
        grid=(num_splits, n_inner),
        in_specs=[pl.BlockSpec((tile_r, _LANES),
                               lambda s, j: (s * n_inner + j, 0))],
        out_specs=pl.BlockSpec((None, _SUBLANES, _LANES),
                               lambda s, j: (s, 0, 0)),
        compiler_params=pltpu.CompilerParams(
            dimension_semantics=("parallel", "arbitrary"),
            vmem_limit_bytes=int(max(32 << 20, 2 * tile_bytes + (4 << 20)))),
        cost_estimate=pl.CostEstimate(
            flops=2 * R * _LANES,
            transcendentals=R * _LANES,
            bytes_accessed=R * _LANES * itemsize
                           + num_splits * _SUBLANES * _LANES * 4),
    )(slab)

    # Single cross-lane/sublane reduce, done once outside the kernel.
    return -(jnp.sum(partials) / num_rows)


def entropy_loss_ref(x, eps=1e-07):
    xf = x.astype(jnp.float32)
    v = xf * jnp.log(xf + eps)
    return jnp.mean(-jnp.sum(v, axis=-1))


if __name__ == "__main__":
    key = jax.random.PRNGKey(0)
    k1, k2, k3 = jax.random.split(key, 3)

    # 1) SALGL-style scene probabilities: batch=8, num_scenes=6
    #    (total elements < 128 -> single masked tile, zero-padded tail).
    x1 = jax.nn.softmax(jax.random.normal(k1, (8, 6), jnp.float32), axis=-1)
    out1 = jax.block_until_ready(entropy_loss(x1))
    ref1 = entropy_loss_ref(x1)
    assert jnp.allclose(out1, ref1, atol=1e-5, rtol=1e-5), (out1, ref1)

    # 2) Ragged multi-dim case (flat-tail padding + masked tail block).
    x2 = jax.nn.softmax(jax.random.normal(k2, (5, 4, 33), jnp.float32), axis=-1)
    out2 = jax.block_until_ready(entropy_loss(x2))
    ref2 = entropy_loss_ref(x2)
    assert jnp.allclose(out2, ref2, atol=1e-5, rtol=1e-5), (out2, ref2)

    # 3) Lane-aligned case with several inner grid steps (tiny tile budget to
    #    exercise the pipelined accumulate-in-output path).
    x3 = jax.nn.softmax(jax.random.normal(k3, (160, 128), jnp.float32), axis=-1)
    out3 = jax.block_until_ready(entropy_loss(x3, _tile_budget_bytes=16 * 1024))
    ref3 = entropy_loss_ref(x3)
    assert jnp.allclose(out3, ref3, atol=1e-5, rtol=1e-5), (out3, ref3)

    print("KERNEL_OK")
</pallas_src>

<mosaic_0001>
module attributes {stable_mosaic.version = 11 : i64} {
  func.func @_entropy_sum_kernel(%arg0: i32, %arg1: i32, %arg2: memref<8x128xf32, #tpu.memory_space<vmem>>, %arg3: memref<1x8x128xf32, #tpu.memory_space<vmem>>) attributes {dimension_semantics = [#tpu.dimension_semantics<parallel>, #tpu.dimension_semantics<arbitrary>], iteration_bounds = array<i64: 1, 1>, scalar_prefetch = 0 : i64, scratch_operands = 0 : i64, tpu.core_type = #tpu.core_type<tc>, window_params = [{transform_indices = @transform_0, window_bounds = array<i64: 8, 128>}, {transform_indices = @transform_1, window_bounds = array<i64: 1, 8, 128>}]} {
    %c0_i32 = arith.constant 0 : i32
    %0 = arith.cmpi eq, %arg1, %c0_i32 : i32
    %1 = arith.extui %0 : i1 to i32
    %c0_i32_0 = arith.constant 0 : i32
    %2 = arith.cmpi ne, %1, %c0_i32_0 : i32
    scf.if %2 {
      %cst_5 = arith.constant 0.000000e+00 : f32
      %16 = vector.broadcast %cst_5 : f32 to vector<8x128xf32>
      %c0_6 = arith.constant 0 : index
      %c0_7 = arith.constant 0 : index
      %c0_8 = arith.constant 0 : index
      %17 = vector.load %arg3[%c0_6, %c0_7, %c0_8] : memref<1x8x128xf32, #tpu.memory_space<vmem>>, vector<1x8x128xf32>
      %18 = vector.shape_cast %17 : vector<1x8x128xf32> to vector<8x128xf32>
      %19 = vector.shape_cast %16 : vector<8x128xf32> to vector<1x8x128xf32>
      tpu.vector_store %arg3[%c0_6, %c0_7, %c0_8], %19 {strides = array<i32>} : memref<1x8x128xf32, #tpu.memory_space<vmem>>, vector<1x8x128xf32>,
    } else {
    }
    %c0 = arith.constant 0 : index
    %c0_1 = arith.constant 0 : index
    %3 = vector.load %arg2[%c0, %c0_1] : memref<8x128xf32, #tpu.memory_space<vmem>>, vector<8x128xf32>
    %cst = arith.constant 1.000000e-07 : f32
    %4 = vector.broadcast %cst : f32 to vector<8x128xf32>
    %5 = arith.addf %3, %4 : vector<8x128xf32>
    %6 = math.log %5 : vector<8x128xf32>
    %7 = arith.mulf %3, %6 : vector<8x128xf32>
    %c1_i32 = arith.constant 1 : i32
    %8 = arith.muli %arg0, %c1_i32 : i32
    %9 = arith.addi %8, %arg1 : i32
    %c0_i32_2 = arith.constant 0 : i32
    %10 = arith.cmpi eq, %9, %c0_i32_2 : i32
    %true = arith.constant true
    %11 = arith.xori %10, %true : i1
    %12 = arith.extui %11 : i1 to i32
    %c0_i32_3 = arith.constant 0 : i32
    %13 = arith.cmpi ne, %12, %c0_i32_3 : i32
    scf.if %13 {
      %c0_5 = arith.constant 0 : index
      %c0_6 = arith.constant 0 : index
      %c0_7 = arith.constant 0 : index
      %16 = vector.load %arg3[%c0_5, %c0_6, %c0_7] : memref<1x8x128xf32, #tpu.memory_space<vmem>>, vector<1x8x128xf32>
      %17 = vector.shape_cast %16 : vector<1x8x128xf32> to vector<8x128xf32>
      %18 = vector.shape_cast %7 : vector<8x128xf32> to vector<1x8x128xf32>
      %cst_8 = arith.constant dense<0.000000e+00> : vector<8x128xf32>
      %19 = vector.multi_reduction <add>, %18, %cst_8 [0] : vector<1x8x128xf32> to vector<8x128xf32>
      %20 = arith.addf %17, %19 : vector<8x128xf32>
      %c0_9 = arith.constant 0 : index
      %c0_10 = arith.constant 0 : index
      %c0_11 = arith.constant 0 : index
      %21 = vector.load %arg3[%c0_9, %c0_10, %c0_11] : memref<1x8x128xf32, #tpu.memory_space<vmem>>, vector<1x8x128xf32>
      %22 = vector.shape_cast %21 : vector<1x8x128xf32> to vector<8x128xf32>
      %23 = vector.shape_cast %20 : vector<8x128xf32> to vector<1x8x128xf32>
      tpu.vector_store %arg3[%c0_9, %c0_10, %c0_11], %23 {strides = array<i32>} : memref<1x8x128xf32, #tpu.memory_space<vmem>>, vector<1x8x128xf32>,
    } else {
    }
    %14 = arith.extui %10 : i1 to i32
    %c0_i32_4 = arith.constant 0 : i32
    %15 = arith.cmpi ne, %14, %c0_i32_4 : i32
    scf.if %15 {
      %16 = tpu.iota {dimensions = array<i32: 0>} : vector<8x128xi32>
      %c8_i32 = arith.constant 8 : i32
      %17 = arith.muli %9, %c8_i32 : i32
      %18 = vector.broadcast %17 : i32 to vector<8x128xi32>
      %19 = arith.addi %18, %16 : vector<8x128xi32>
      %c1_i32_5 = arith.constant 1 : i32
      %20 = vector.broadcast %c1_i32_5 : i32 to vector<8x128xi32>
      %21 = arith.cmpi slt, %19, %20 : vector<8x128xi32>
      %c0_6 = arith.constant 0 : index
      %c0_7 = arith.constant 0 : index
      %c0_8 = arith.constant 0 : index
      %22 = vector.load %arg3[%c0_6, %c0_7, %c0_8] : memref<1x8x128xf32, #tpu.memory_space<vmem>>, vector<1x8x128xf32>
      %23 = vector.shape_cast %22 : vector<1x8x128xf32> to vector<8x128xf32>
      %cst_9 = arith.constant 0.000000e+00 : f32
      %24 = vector.broadcast %cst_9 : f32 to vector<8x128xf32>
      %25 = arith.select %21, %7, %24 : vector<8x128xi1>, vector<8x128xf32>
      %26 = vector.shape_cast %25 : vector<8x128xf32> to vector<1x8x128xf32>
      %cst_10 = arith.constant dense<0.000000e+00> : vector<8x128xf32>
      %27 = vector.multi_reduction <add>, %26, %cst_10 [0] : vector<1x8x128xf32> to vector<8x128xf32>
      %28 = arith.addf %23, %27 : vector<8x128xf32>
      %c0_11 = arith.constant 0 : index
      %c0_12 = arith.constant 0 : index
      %c0_13 = arith.constant 0 : index
      %29 = vector.load %arg3[%c0_11, %c0_12, %c0_13] : memref<1x8x128xf32, #tpu.memory_space<vmem>>, vector<1x8x128xf32>
      %30 = vector.shape_cast %29 : vector<1x8x128xf32> to vector<8x128xf32>
      %31 = vector.shape_cast %28 : vector<8x128xf32> to vector<1x8x128xf32>
      tpu.vector_store %arg3[%c0_11, %c0_12, %c0_13], %31 {strides = array<i32>} : memref<1x8x128xf32, #tpu.memory_space<vmem>>, vector<1x8x128xf32>,
    } else {
    }
    return
  }
  func.func @transform_0(%arg0: i32, %arg1: i32) -> (i32, i32) {
    %c1_i32 = arith.constant 1 : i32
    %0 = arith.muli %arg0, %c1_i32 : i32
    %1 = arith.addi %0, %arg1 : i32
    %c0_i32 = arith.constant 0 : i32
    %c0_i32_0 = arith.constant 0 : i32
    return %1, %c0_i32 : i32, i32
  }
  func.func @transform_1(%arg0: i32, %arg1: i32) -> (i32, i32, i32) {
    %c0_i32 = arith.constant 0 : i32
    %c0_i32_0 = arith.constant 0 : i32
    %c0_i32_1 = arith.constant 0 : i32
    return %arg0, %c0_i32, %c0_i32_0 : i32, i32, i32
  }
}

</mosaic_0001>

<bundles_post_ra>
// kernel: tpu_custom_call.1
= control target key start
LH: loop header
LB: loop body
LE: loop exit
PB: predicated region body
PF: predicated region fallthrough
CT: control target
= control target key end

     0   :  { %6 = vsyncpa [#allocation3], 0  ;;  %s164_s0 = inlined_call_operand.hbm [shape: f32[1,128], index: 0, kind: input, shape index: {}]   ;;  %s165_s1 = inlined_call_operand.hbm [shape: f32[1,8,128], index: 1, kind: output, shape index: {}]  }
   0x1   :  { %7 = vsyncpa [#allocation4], 0 }
   0x2   :  { %15 = vsyncadd [#allocation3], 112  ;;  %s18_s8 = sshll.u32 %s164_s0, 4  ;;  %s144_s9 = smov [#allocation2]   ;;  %s19_s8 = int_to_ptr.hbm [resolvable:$true] %s18_s8 }
   0x3   :  { %s20_s10 = sshll.u32 %s144_s9, 4  ;;  %s145_s11 = smov 16   ;;  %s21_s10 = int_to_ptr.vmem [resolvable:$true] %s20_s10 }
   0x4   :  { %s146_s12 = smov 1  }
   0x5   :  { %26 = dma.hbm_to_vmem [thread:$0]  %s19_s8, 16, %s21_s10, [#allocation3], %s145_s11, %s145_s11, %s146_s12  }
   0x6   :  { %140 = dma.done.wait [#allocation3], 128  }
   0x7   :  { %141 = vsyncadd [#allocation3], 4294967168  ;;  %v39_v0 = vld [vmem:[#allocation2] sm:$0xff]  ;;  %v57_v2 = vlaneseq  ;;  %s147_s13 = smov [#allocation5]   ;;  %s75_s16 = sshll.u32 %s165_s1, 4  ;;  %s76_s16 = int_to_ptr.hbm [resolvable:$true] %s75_s16 }
   0x8   :  { %v40_v1 = vadd.f32 1e-07, %v39_v0  ;;  %s73_s0 = sshll.u32 %s147_s13, 4  ;;  %s74_s0 = int_to_ptr.vmem [resolvable:$true] %s73_s0 }
   0x9   :  { %v58_v3 = vshrl.u32 %v57_v2, 7 }
   0xa   :  { %90 = vlog2.f32 %v40_v1 }
   0xb   :  { %vm62_vm0 = vcmp.lt.s32.totalorder %v58_v3, 1 }
  0x10   :  { %v91_v4 = vpop.eup %90 }
  0x11   :  { %v42_v5 = vmul.f32 0.6931472, %v91_v4 }
  0x13   :  { %v43_v6 = vmul.f32 %v42_v5, %v39_v0 }
  0x15   :  { %v64_v7 = vsel %vm62_vm0, %v43_v6, 0.0 }
  0x16   :  { %67 = vst [vmem:[#allocation5] sm:$0xff] %v64_v7 }
  0x17   :  { %78 = dma.vmem_to_hbm [thread:$0]  %s74_s0, 128, %s76_s16, [#allocation4]  }
  0x18   :  { %142 = dma.done.wait [#allocation4], 128  }
  0x19   :  { %143 = vsyncadd [#allocation4], 4294967168 }
  0x1a   :  { %83 = vsyncpa [#allocation3], 1 }
  0x1b   :  { %84 = vsyncpa [#allocation4], 1 }

</bundles_post_ra>
